<compile_context>
chip_gen: v7x
topology: tpu7x:2x2x1
jax: 0.10.0
libtpu: 0.0.40
codegen_flags: <defaults>
</compile_context>

<pallas_src>
import functools

import jax
import jax.numpy as jnp
from jax.experimental import pallas as pl
from jax.experimental.pallas import tpu as pltpu

LOG_2PI = 1.8378770664093453  # log(2*pi)
SQUASH_EPS = 1e-6             # SB3 epsilon for the tanh-squash log-det correction

_MAX_TILE = 1024              # per-step batch rows (review: step-overhead bound)
_SUBLANE = 8


def _round_up(x, m):
    return ((x + m - 1) // m) * m


def _cdiv(a, b):
    return (a + b - 1) // b


def _pick_batch_tile(B):
    """Batch tile: big (amortize ~0.35us/step), bounded (VMEM-safe), >=2 steps for large B."""
    if B >= 2 * _MAX_TILE:
        return _MAX_TILE                               # fixed tile, many steps
    if B > _MAX_TILE:
        return _round_up(_cdiv(B, 2), _SUBLANE)        # exactly 2 steps -> both v7x TCs busy
    if B <= _SUBLANE:
        return B                                       # block == full array dims
    return _round_up(B, _SUBLANE)                      # single sublane-aligned step


def _policy_kernel(obs_ref, eps_ref, w_sh_ref, w_pivf_ref, w_head_ref, bias_ref,
                   out_ref, *, shared_pad, hidden_pad, head_pad, action_dim,
                   out_width):
    A = action_dim

    obs = obs_ref[...]            # [tb, state_dim]
    eps = eps_ref[...]            # [tb, A] standard-normal noise
    tb = obs.shape[0]

    # Packed constants (one DMA). Rows 0..2 are read as lane-aligned 128-multiples.
    b_sh   = bias_ref[0:1, :shared_pad]   # [1, shared_pad]   (b_sh  | 0)
    b_pivf = bias_ref[1:2, :hidden_pad]   # [1, hidden_pad]   (b_pi | b_vf | 0)
    b_head = bias_ref[2:3, :head_pad]     # [1, head_pad]     (b_a  | b_v  | 0)
    std    = bias_ref[3:4, :A]            # [1, A]  exp(log_std) (precomputed)
    c      = bias_ref[4:5, :A]            # [1, A]  log_std + 0.5*log(2*pi)

    # ---- shared trunk (lane-dense: shared_dim zero-padded to 128-multiple) ----
    shared = jnp.tanh(
        jnp.dot(obs, w_sh_ref[...], preferred_element_type=jnp.float32) + b_sh)

    # ---- fused pi|vf heads: one lane-dense N = hidden_pad matmul ----
    latent = jnp.tanh(
        jnp.dot(shared, w_pivf_ref[...], preferred_element_type=jnp.float32) + b_pivf)
    # latent[:, :pi_dim] == latent_pi, latent[:, pi_dim:pi+vf] == latent_vf

    # ---- fused action_net + value_net via block-diagonal [hidden_pad, head_pad] ----
    head = jnp.dot(latent, w_head_ref[...], preferred_element_type=jnp.float32) + b_head
    mean_actions = head[:, :A]            # latent_pi @ W_a + b_a
    values = head[:, A:A + 1]             # latent_vf @ W_v + b_v

    # ---- squashed diag-Gaussian sampling ----
    gauss = mean_actions + std * eps
    actions = jnp.tanh(gauss)

    # Normal log-prob per dim ((gauss - mean)/std == eps) + tanh correction,
    # kept in SB3's exact log(1 - a^2 + 1e-6) form.
    lp = -0.5 * (eps * eps) - c - jnp.log(1.0 - actions * actions + SQUASH_EPS)
    log_prob = jnp.sum(lp, axis=-1, keepdims=True)   # [tb, 1]

    # Single lane-dense (width 128) slab -> one unmasked full-width store.
    pad_lanes = out_width - (A + 2)
    slab = jnp.concatenate(
        [actions, values, log_prob, jnp.zeros((tb, pad_lanes), jnp.float32)], axis=-1)
    out_ref[...] = slab


def pack_params(params, weight_dtype=jnp.float32):
    """One-time fusion/packing of the 11 raw parameters into 4 lane-dense kernel operands.

    weight_dtype=jnp.bfloat16 is the recommended setting for v6e/v7x serving at
    larger MLP dims (matmul accumulation stays f32 in-kernel).
    """
    state_dim, shared_dim = params["w_sh"].shape
    pi_dim = params["w_pi"].shape[1]
    vf_dim = params["w_vf"].shape[1]
    A = params["w_a"].shape[1]
    H = pi_dim + vf_dim

    # Lane-pad every matmul output width to a multiple of 128 (zeros are inert:
    # tanh(0)=0 and the corresponding downstream rows are also zero).
    S_P = _round_up(shared_dim, 128)
    H_P = _round_up(H, 128)
    O_P = _round_up(A + 1, 128)

    w_sh = jnp.zeros((state_dim, S_P), jnp.float32).at[:, :shared_dim].set(
        params["w_sh"].astype(jnp.float32))

    w_pivf = jnp.zeros((S_P, H_P), jnp.float32)
    w_pivf = w_pivf.at[:shared_dim, :pi_dim].set(params["w_pi"].astype(jnp.float32))
    w_pivf = w_pivf.at[:shared_dim, pi_dim:H].set(params["w_vf"].astype(jnp.float32))

    # Block-diagonal action|value head weight: [H_P, O_P].
    w_head = jnp.zeros((H_P, O_P), jnp.float32)
    w_head = w_head.at[:pi_dim, :A].set(params["w_a"].astype(jnp.float32))
    w_head = w_head.at[pi_dim:H, A:A + 1].set(params["w_v"].astype(jnp.float32))

    # Lane-padded bias/constant pack: [5, W].
    W = max(S_P, H_P, O_P)

    def row(vec, n):
        r = jnp.zeros((1, W), jnp.float32)
        return r.at[:, :n].set(jnp.reshape(vec, (1, n)).astype(jnp.float32))

    log_std = jnp.reshape(params["log_std"], (1, A)).astype(jnp.float32)
    bias_pack = jnp.concatenate(
        [
            row(params["b_sh"], shared_dim),
            row(jnp.concatenate([jnp.reshape(params["b_pi"], (1, pi_dim)),
                                 jnp.reshape(params["b_vf"], (1, vf_dim))], axis=1), H),
            row(jnp.concatenate([jnp.reshape(params["b_a"], (1, A)),
                                 jnp.reshape(params["b_v"], (1, 1))], axis=1), A + 1),
            row(jnp.exp(log_std), A),                 # std
            row(log_std + 0.5 * LOG_2PI, A),          # log_std + 0.5*log(2*pi)
        ],
        axis=0,
    )

    packed = {
        "w_sh": w_sh.astype(weight_dtype),
        "w_pivf": w_pivf.astype(weight_dtype),
        "w_head": w_head.astype(weight_dtype),
        "bias_pack": bias_pack,                       # elementwise path stays f32
    }
    dims = dict(shared_pad=S_P, hidden_pad=H_P, head_pad=O_P, action_dim=A)
    return packed, dims


def dualing_post_policy_forward(obs, eps, packed, *, shared_pad, hidden_pad,
                                head_pad, action_dim):
    """Fused forward pass. Returns (actions [B,A], values [B,1], log_prob [B])."""
    B, state_dim = obs.shape
    A = action_dim

    w_sh = packed["w_sh"]
    w_pivf = packed["w_pivf"]
    w_head = packed["w_head"]
    bias_pack = packed["bias_pack"]

    tb = _pick_batch_tile(B)
    B_pad = _round_up(B, tb)
    if B_pad != B:
        # Zero-pad the batch: padded rows flow through finitely and are sliced away.
        obs = jnp.pad(obs, ((0, B_pad - B), (0, 0)))
        eps = jnp.pad(eps, ((0, B_pad - B), (0, 0)))
    grid = (B_pad // tb,)

    out_width = _round_up(A + 2, 128)   # lane-dense packed output slab width

    kernel = functools.partial(
        _policy_kernel, shared_pad=shared_pad, hidden_pad=hidden_pad,
        head_pad=head_pad, action_dim=A, out_width=out_width)

    # Advisory cost estimate so XLA can overlap this tiny custom call.
    flops = int(2 * B_pad * (state_dim * shared_pad
                             + shared_pad * hidden_pad
                             + hidden_pad * head_pad))
    transcendentals = int(B_pad * (shared_pad + hidden_pad + 2 * A))
    bytes_accessed = int(4 * (B_pad * (state_dim + A + out_width)
                              + w_sh.size + w_pivf.size + w_head.size
                              + bias_pack.size))

    out = pl.pallas_call(
        kernel,
        out_shape=jax.ShapeDtypeStruct((B_pad, out_width), jnp.float32),
        grid=grid,
        in_specs=[
            pl.BlockSpec((tb, state_dim), lambda i: (i, 0)),   # obs: tiled over batch
            pl.BlockSpec((tb, A), lambda i: (i, 0)),           # eps: tiled over batch
            pl.BlockSpec(w_sh.shape, lambda i: (0, 0)),        # weights: VMEM-resident
            pl.BlockSpec(w_pivf.shape, lambda i: (0, 0)),
            pl.BlockSpec(w_head.shape, lambda i: (0, 0)),
            pl.BlockSpec(bias_pack.shape, lambda i: (0, 0)),
        ],
        out_specs=pl.BlockSpec((tb, out_width), lambda i: (i, 0)),
        compiler_params=pltpu.CompilerParams(
            dimension_semantics=("parallel",),
            vmem_limit_bytes=32 << 20),
        cost_estimate=pl.CostEstimate(flops=flops,
                                      transcendentals=transcendentals,
                                      bytes_accessed=bytes_accessed),
    )(obs, eps, w_sh, w_pivf, w_head, bias_pack)

    # Split/strip the packed, padded output inside the same jit.
    actions = out[:B, :A]
    values = out[:B, A:A + 1]
    log_prob = out[:B, A + 1]
    return actions, values, log_prob


def init_params(key, state_dim, shared_dim, pi_dim, vf_dim, action_dim,
                log_std_init=0.0):
    """Deterministic synthetic parameter init (fan-in scaled normal)."""
    ks = jax.random.split(key, 10)

    def lin(k, fan_in, fan_out):
        return jax.random.normal(k, (fan_in, fan_out), jnp.float32) / jnp.sqrt(fan_in)

    return {
        "w_sh": lin(ks[0], state_dim, shared_dim),
        "b_sh": jnp.zeros((1, shared_dim), jnp.float32),
        "w_pi": lin(ks[1], shared_dim, pi_dim),
        "b_pi": jnp.zeros((1, pi_dim), jnp.float32),
        "w_vf": lin(ks[2], shared_dim, vf_dim),
        "b_vf": jnp.zeros((1, vf_dim), jnp.float32),
        "w_v": lin(ks[3], vf_dim, 1),
        "b_v": jnp.zeros((1, 1), jnp.float32),
        "w_a": lin(ks[4], pi_dim, action_dim),
        "b_a": jnp.zeros((1, action_dim), jnp.float32),
        "log_std": jnp.full((1, action_dim), log_std_init, jnp.float32),
    }


def reference_forward(obs, eps, p):
    """Pure-JAX reference for the same math (sanity check)."""
    shared = jnp.tanh(obs @ p["w_sh"] + p["b_sh"])
    lpi = jnp.tanh(shared @ p["w_pi"] + p["b_pi"])
    lvf = jnp.tanh(shared @ p["w_vf"] + p["b_vf"])
    values = lvf @ p["w_v"] + p["b_v"]
    mean = lpi @ p["w_a"] + p["b_a"]
    gauss = mean + jnp.exp(p["log_std"]) * eps
    actions = jnp.tanh(gauss)
    lp = -0.5 * eps**2 - p["log_std"] - 0.5 * LOG_2PI
    lp = lp - jnp.log(1.0 - actions**2 + SQUASH_EPS)
    return actions, values, jnp.sum(lp, axis=-1)


if __name__ == "__main__":
    B, STATE_DIM, SHARED, PI_DIM, VF_DIM, ACTION_DIM = 8, 32, 64, 64, 64, 4

    key = jax.random.PRNGKey(0)
    k_obs, k_eps, k_param = jax.random.split(key, 3)

    obs = jax.random.normal(k_obs, (B, STATE_DIM), jnp.float32)
    eps = jax.random.normal(k_eps, (B, ACTION_DIM), jnp.float32)  # deterministic noise
    params = init_params(k_param, STATE_DIM, SHARED, PI_DIM, VF_DIM, ACTION_DIM,
                         log_std_init=0.0)

    # One-time operand fusion/packing (weight-stationary across policy steps).
    # Use weight_dtype=jnp.bfloat16 for large-dim v6e/v7x serving; f32 here to hold
    # the 1e-4 correctness tolerance against the f32 reference.
    packed, dims = pack_params(params, weight_dtype=jnp.float32)
    packed = jax.tree_util.tree_map(jax.device_put, packed)

    fwd = jax.jit(functools.partial(dualing_post_policy_forward, **dims))
    actions, values, log_prob = fwd(obs, eps, packed)
    jax.block_until_ready((actions, values, log_prob))

    ref_a, ref_v, ref_lp = reference_forward(obs, eps, params)
    assert actions.shape == (B, ACTION_DIM)
    assert values.shape == (B, 1)
    assert log_prob.shape == (B,)
    assert jnp.allclose(actions, ref_a, rtol=1e-4, atol=1e-4)
    assert jnp.allclose(values, ref_v, rtol=1e-4, atol=1e-4)
    assert jnp.allclose(log_prob, ref_lp, rtol=1e-4, atol=1e-4)

    print("KERNEL_OK")
</pallas_src>

<mosaic_0001>
module attributes {stable_mosaic.version = 11 : i64} {
  func.func @_policy_kernel(%arg0: i32, %arg1: memref<8x32xf32, #tpu.memory_space<vmem>>, %arg2: memref<8x4xf32, #tpu.memory_space<vmem>>, %arg3: memref<32x128xf32, #tpu.memory_space<vmem>>, %arg4: memref<128x128xf32, #tpu.memory_space<vmem>>, %arg5: memref<128x128xf32, #tpu.memory_space<vmem>>, %arg6: memref<5x128xf32, #tpu.memory_space<vmem>>, %arg7: memref<8x128xf32, #tpu.memory_space<vmem>>) attributes {dimension_semantics = [#tpu.dimension_semantics<parallel>], iteration_bounds = array<i64: 1>, scalar_prefetch = 0 : i64, scratch_operands = 0 : i64, tpu.core_type = #tpu.core_type<tc>, window_params = [{transform_indices = @transform_0, window_bounds = array<i64: 8, 32>}, {transform_indices = @transform_1, window_bounds = array<i64: 8, 4>}, {pipeline_mode = #tpu.pipeline_mode<synchronous>, transform_indices = @transform_2, window_bounds = array<i64: 32, 128>}, {pipeline_mode = #tpu.pipeline_mode<synchronous>, transform_indices = @transform_3, window_bounds = array<i64: 128, 128>}, {pipeline_mode = #tpu.pipeline_mode<synchronous>, transform_indices = @transform_4, window_bounds = array<i64: 128, 128>}, {pipeline_mode = #tpu.pipeline_mode<synchronous>, transform_indices = @transform_5, window_bounds = array<i64: 5, 128>}, {transform_indices = @transform_6, window_bounds = array<i64: 8, 128>}]} {
    %c0 = arith.constant 0 : index
    %c0_0 = arith.constant 0 : index
    %0 = vector.load %arg1[%c0, %c0_0] : memref<8x32xf32, #tpu.memory_space<vmem>>, vector<8x32xf32>
    %c0_1 = arith.constant 0 : index
    %c0_2 = arith.constant 0 : index
    %1 = vector.load %arg2[%c0_1, %c0_2] : memref<8x4xf32, #tpu.memory_space<vmem>>, vector<8x4xf32>
    %c0_3 = arith.constant 0 : index
    %c0_4 = arith.constant 0 : index
    %2 = vector.load %arg6[%c0_3, %c0_4] : memref<5x128xf32, #tpu.memory_space<vmem>>, vector<1x128xf32>
    %c1 = arith.constant 1 : index
    %c0_5 = arith.constant 0 : index
    %3 = vector.load %arg6[%c1, %c0_5] : memref<5x128xf32, #tpu.memory_space<vmem>>, vector<1x128xf32>
    %c2 = arith.constant 2 : index
    %c0_6 = arith.constant 0 : index
    %4 = vector.load %arg6[%c2, %c0_6] : memref<5x128xf32, #tpu.memory_space<vmem>>, vector<1x128xf32>
    %c3 = arith.constant 3 : index
    %c0_7 = arith.constant 0 : index
    %5 = vector.load %arg6[%c3, %c0_7] : memref<5x128xf32, #tpu.memory_space<vmem>>, vector<1x4xf32>
    %c4 = arith.constant 4 : index
    %c0_8 = arith.constant 0 : index
    %6 = vector.load %arg6[%c4, %c0_8] : memref<5x128xf32, #tpu.memory_space<vmem>>, vector<1x4xf32>
    %c0_9 = arith.constant 0 : index
    %c0_10 = arith.constant 0 : index
    %7 = vector.load %arg3[%c0_9, %c0_10] : memref<32x128xf32, #tpu.memory_space<vmem>>, vector<32x128xf32>
    %cst = arith.constant dense<0.000000e+00> : vector<8x128xf32>
    %8 = tpu.matmul %0, %7, %cst {dimension_numbers = #tpu.dot_dimension_numbers<[1], [0], [0], [1], [0, 0, 1, 1], [], []>} : vector<8x32xf32>, vector<32x128xf32>, vector<8x128xf32> -> vector<8x128xf32>
    %9 = vector.broadcast %2 : vector<1x128xf32> to vector<8x128xf32>
    %10 = arith.addf %8, %9 : vector<8x128xf32>
    %11 = math.tanh %10 : vector<8x128xf32>
    %c0_11 = arith.constant 0 : index
    %c0_12 = arith.constant 0 : index
    %12 = vector.load %arg4[%c0_11, %c0_12] : memref<128x128xf32, #tpu.memory_space<vmem>>, vector<128x128xf32>
    %cst_13 = arith.constant dense<0.000000e+00> : vector<8x128xf32>
    %13 = tpu.matmul %11, %12, %cst_13 {dimension_numbers = #tpu.dot_dimension_numbers<[1], [0], [0], [1], [0, 0, 1, 1], [], []>} : vector<8x128xf32>, vector<128x128xf32>, vector<8x128xf32> -> vector<8x128xf32>
    %14 = vector.broadcast %3 : vector<1x128xf32> to vector<8x128xf32>
    %15 = arith.addf %13, %14 : vector<8x128xf32>
    %16 = math.tanh %15 : vector<8x128xf32>
    %c0_14 = arith.constant 0 : index
    %c0_15 = arith.constant 0 : index
    %17 = vector.load %arg5[%c0_14, %c0_15] : memref<128x128xf32, #tpu.memory_space<vmem>>, vector<128x128xf32>
    %cst_16 = arith.constant dense<0.000000e+00> : vector<8x128xf32>
    %18 = tpu.matmul %16, %17, %cst_16 {dimension_numbers = #tpu.dot_dimension_numbers<[1], [0], [0], [1], [0, 0, 1, 1], [], []>} : vector<8x128xf32>, vector<128x128xf32>, vector<8x128xf32> -> vector<8x128xf32>
    %19 = vector.broadcast %4 : vector<1x128xf32> to vector<8x128xf32>
    %20 = arith.addf %18, %19 : vector<8x128xf32>
    %21 = vector.extract_strided_slice %20 {offsets = [0, 0], sizes = [8, 4], strides = [1, 1]} : vector<8x128xf32> to vector<8x4xf32>
    %22 = vector.extract_strided_slice %20 {offsets = [0, 4], sizes = [8, 1], strides = [1, 1]} : vector<8x128xf32> to vector<8x1xf32>
    %23 = vector.broadcast %5 : vector<1x4xf32> to vector<8x4xf32>
    %24 = arith.mulf %23, %1 : vector<8x4xf32>
    %25 = arith.addf %21, %24 : vector<8x4xf32>
    %26 = math.tanh %25 : vector<8x4xf32>
    %27 = arith.mulf %1, %1 : vector<8x4xf32>
    %cst_17 = arith.constant -5.000000e-01 : f32
    %28 = vector.broadcast %cst_17 : f32 to vector<8x4xf32>
    %29 = arith.mulf %28, %27 : vector<8x4xf32>
    %30 = vector.broadcast %6 : vector<1x4xf32> to vector<8x4xf32>
    %31 = arith.subf %29, %30 : vector<8x4xf32>
    %32 = arith.mulf %26, %26 : vector<8x4xf32>
    %cst_18 = arith.constant 1.000000e+00 : f32
    %33 = vector.broadcast %cst_18 : f32 to vector<8x4xf32>
    %34 = arith.subf %33, %32 : vector<8x4xf32>
    %cst_19 = arith.constant 9.99999997E-7 : f32
    %35 = vector.broadcast %cst_19 : f32 to vector<8x4xf32>
    %36 = arith.addf %34, %35 : vector<8x4xf32>
    %37 = math.log %36 : vector<8x4xf32>
    %38 = arith.subf %31, %37 : vector<8x4xf32>
    %cst_20 = arith.constant dense<0.000000e+00> : vector<8xf32>
    %39 = vector.multi_reduction <add>, %38, %cst_20 [1] : vector<8x4xf32> to vector<8xf32>
    %40 = vector.shape_cast %39 : vector<8xf32> to vector<8x1xf32>
    %cst_21 = arith.constant 0.000000e+00 : f32
    %41 = vector.broadcast %cst_21 : f32 to vector<8x122xf32>
    %42 = tpu.concatenate %26, %22, %40, %41 in 1 : vector<8x4xf32>, vector<8x1xf32>, vector<8x1xf32>, vector<8x122xf32> -> vector<8x128xf32>
    %c0_22 = arith.constant 0 : index
    %c0_23 = arith.constant 0 : index
    %43 = vector.load %arg7[%c0_22, %c0_23] : memref<8x128xf32, #tpu.memory_space<vmem>>, vector<8x128xf32>
    tpu.vector_store %arg7[%c0_22, %c0_23], %42 {strides = array<i32>} : memref<8x128xf32, #tpu.memory_space<vmem>>, vector<8x128xf32>,
    return
  }
  func.func @transform_0(%arg0: i32) -> (i32, i32) {
    %c0_i32 = arith.constant 0 : i32
    %c0_i32_0 = arith.constant 0 : i32
    return %arg0, %c0_i32 : i32, i32
  }
  func.func @transform_1(%arg0: i32) -> (i32, i32) {
    %c0_i32 = arith.constant 0 : i32
    %c0_i32_0 = arith.constant 0 : i32
    return %arg0, %c0_i32 : i32, i32
  }
  func.func @transform_2(%arg0: i32) -> (i32, i32) {
    %c0_i32 = arith.constant 0 : i32
    %c0_i32_0 = arith.constant 0 : i32
    %c0_i32_1 = arith.constant 0 : i32
    return %c0_i32, %c0_i32_0 : i32, i32
  }
  func.func @transform_3(%arg0: i32) -> (i32, i32) {
    %c0_i32 = arith.constant 0 : i32
    %c0_i32_0 = arith.constant 0 : i32
    %c0_i32_1 = arith.constant 0 : i32
    return %c0_i32, %c0_i32_0 : i32, i32
  }
  func.func @transform_4(%arg0: i32) -> (i32, i32) {
    %c0_i32 = arith.constant 0 : i32
    %c0_i32_0 = arith.constant 0 : i32
    %c0_i32_1 = arith.constant 0 : i32
    return %c0_i32, %c0_i32_0 : i32, i32
  }
  func.func @transform_5(%arg0: i32) -> (i32, i32) {
    %c0_i32 = arith.constant 0 : i32
    %c0_i32_0 = arith.constant 0 : i32
    %c0_i32_1 = arith.constant 0 : i32
    return %c0_i32, %c0_i32_0 : i32, i32
  }
  func.func @transform_6(%arg0: i32) -> (i32, i32) {
    %c0_i32 = arith.constant 0 : i32
    %c0_i32_0 = arith.constant 0 : i32
    return %arg0, %c0_i32 : i32, i32
  }
}

</mosaic_0001>

<bundles_post_ra>
// kernel: dualing_post_policy_forward.1
= control target key start
LH: loop header
LB: loop body
LE: loop exit
PB: predicated region body
PF: predicated region fallthrough
CT: control target
= control target key end

     0   :  { %11 = vsyncpa [#allocation3], 0  ;;  %s777_s0 = inlined_call_operand.vmem [shape: f32[8,32], index: 0, kind: input, shape index: {}]   ;;  %s778_s1 = inlined_call_operand.vmem [shape: f32[8,4], index: 1, kind: input, shape index: {}]   ;;  %s779_s2 = inlined_call_operand.hbm [shape: f32[32,128], index: 2, kind: input, shape index: {}]   ;;  %s780_s3 = inlined_call_operand.hbm [shape: f32[128,128], index: 3, kind: input, shape index: {}]   ;;  %s781_s4 = inlined_call_operand.hbm [shape: f32[128,128], index: 4, kind: input, shape index: {}]   ;;  %s782_s5 = inlined_call_operand.vmem [shape: f32[5,128], index: 5, kind: input, shape index: {}]   ;;  %s783_s6 = inlined_call_operand.vmem [shape: f32[8,128], index: 6, kind: output, shape index: {}]  }
   0x1   :  { %12 = vsyncpa [#allocation5], 0  ;;  %s637_s21 = smov [#allocation4]   ;;  %s638_s23 = smov [#allocation2]  }
   0x2   :  { %s34_s22 = sshll.u32 %s637_s21, 4  ;;  %s22_s24 = sshll.u32 %s638_s23, 4  ;;  %s35_s22 = int_to_ptr.vmem [resolvable:$true] %s34_s22  ;;  %s680_s24 = int_to_ptr.vmem [resolvable:$true] %s22_s24 }
   0x3   :  { %s567_s27 = scalar_lea.hbm %s780_s3, 2048 }
   0x4   :  { %p568_p0 = scmp.ne.s32.totalorder %s780_s3, %s567_s27  ;;  %p571_p1 = scmp.lt.u32.totalorder %s567_s27, %s780_s3 }
   0x6   :  { %p573_p2 = pnand %p571_p1, %p568_p0 }
   0x8   :  { %576 = shalt.err (!%p573_p2)
}
   0x9   :  { %s577_s8 = scalar_lea.vmem %s35_s22, 2048  ;;  %p582_p4 = scmp.lt.s32.totalorder %s35_s22, %s35_s22 }
   0xa   :  { %p578_p3 = scmp.ne.s32.totalorder %s35_s22, %s577_s8  ;;  %p583_p5 = scmp.lt.s32.totalorder %s577_s8, %s577_s8 }
   0xc   :  { %p584_p6 = por %p583_p5, %p582_p4 }
   0xe   :  { %p585_p7 = pnand %p584_p6, %p578_p3 }
  0x10   :  { %588 = shalt.err (!%p585_p7)
}
  0x11   :  { %s639_s9 = smov 128   ;;  %s640_s10 = smov 8  }
  0x12   :  { %40 = dma.hbm_to_vmem [thread:$0]  %s780_s3, 2048, %s35_s22, [#allocation5], %s639_s9, %s639_s9, %s640_s10  }
  0x13   :  { %s589_s15 = scalar_lea.hbm %s779_s2, 512 }
  0x14   :  { %p590_p8 = scmp.ne.s32.totalorder %s779_s2, %s589_s15  ;;  %p593_p9 = scmp.lt.u32.totalorder %s589_s15, %s779_s2 }
  0x16   :  { %p595_p10 = pnand %p593_p9, %p590_p8 }
  0x18   :  { %598 = shalt.err (!%p595_p10)
}
  0x19   :  { %s599_s20 = scalar_lea.vmem %s680_s24, 512  ;;  %p604_p12 = scmp.lt.s32.totalorder %s680_s24, %s680_s24 }
  0x1a   :  { %p600_p11 = scmp.ne.s32.totalorder %s680_s24, %s599_s20  ;;  %p605_p13 = scmp.lt.s32.totalorder %s599_s20, %s599_s20 }
  0x1c   :  { %p606_p0 = por %p605_p13, %p604_p12 }
  0x1e   :  { %p607_p1 = pnand %p606_p0, %p600_p11 }
  0x20   :  { %610 = shalt.err (!%p607_p1)
}
  0x21   :  { %28 = dma.hbm_to_vmem [thread:$0]  %s779_s2, 512, %s680_s24, [#allocation3], %s639_s9, %s639_s9, %s640_s10  }
  0x22   :  { %s641_s22 = smov [#allocation6]   ;;  %s611_s27 = scalar_lea.hbm %s781_s4, 2048 }
  0x23   :  { %s46_s23 = sshll.u32 %s641_s22, 4  ;;  %p612_p2 = scmp.ne.s32.totalorder %s781_s4, %s611_s27  ;;  %s47_s23 = int_to_ptr.vmem [resolvable:$true] %s46_s23 }
  0x24   :  { %p615_p3 = scmp.lt.u32.totalorder %s611_s27, %s781_s4 }
  0x26   :  { %p617_p4 = pnand %p615_p3, %p612_p2 }
  0x28   :  { %620 = shalt.err (!%p617_p4)
}
  0x29   :  { %s621_s8 = scalar_lea.vmem %s47_s23, 2048  ;;  %p626_p6 = scmp.lt.s32.totalorder %s47_s23, %s47_s23 }
  0x2a   :  { %p622_p5 = scmp.ne.s32.totalorder %s47_s23, %s621_s8  ;;  %p627_p7 = scmp.lt.s32.totalorder %s621_s8, %s621_s8 }
  0x2c   :  { %p628_p8 = por %p627_p7, %p626_p6 }
  0x2e   :  { %p629_p9 = pnand %p628_p8, %p622_p5 }
  0x30   :  { %632 = shalt.err (!%p629_p9)
}
  0x31   :  { %52 = dma.hbm_to_vmem [thread:$0]  %s781_s4, 2048, %s47_s23, [#allocation5], %s639_s9, %s639_s9, %s640_s10  }
  0x32   :  { %633 = dma.done.wait [#allocation3], 512  }
  0x33   :  { %634 = vsyncadd [#allocation3], 4294966784 }
  0x34   :  { %635 = dma.done.wait [#allocation5], 4096  }
  0x35   :  { %636 = vsyncadd [#allocation5], 4294963200  ;;  %v642_v0 = vmov 0.0|0.0   ;;  %vm643_vm0 = vmmov 0   ;;  %v644_v1 = vmov 0.0   ;;  %v71_v2 = vld [vmem:[#allocation2] sm:$0xff] }
  0x36   :  { %497 = vmatprep.subr.bf16.mxu0 %v642_v0  ;;  %424 = vmatprep.mubr.msk.f32.mxu0 %vm643_vm0, %v644_v1  ;;  %v72_v3 = vld [vmem:[#allocation2 + $0x8] sm:$0xff]  ;;  %v73_v4 = vld [vmem:[#allocation2 + $0x10] sm:$0xff]  ;;  %v74_v6 = vld [vmem:[#allocation2 + $0x18] sm:$0xff]  ;;  %vm79_vm1 = vcmask 261120   ;;  %vm355_vm2 = vcmask 31744   ;;  %vm360_vm3 = vcmask 39936  }
  0x37   :  { %503 = vmatprep.subr.bf16.mxu1 %v642_v0  ;;  %459 = vmatprep.mubr.msk.f32.mxu1 %vm643_vm0, %v644_v1  ;;  %v498_v5 = vpack.c.bf16 %v72_v3, %v71_v2  ;;  %v154_v7 = vld [vmem:[#allocation4] sm:$0xff]  ;;  %v155_v8 = vld [vmem:[#allocation4 + $0x8] sm:$0xff]  ;;  %v156_v9 = vld [vmem:[#allocation4 + $0x10] sm:$0xff]  ;;  %v501_v11 = vpack.c.bf16 %v74_v6, %v73_v4  ;;  %vm362_vm4 = vcmask 48128  }
  0x38   :  { %v157_v10 = vld [vmem:[#allocation4 + $0x18] sm:$0xff]  ;;  %v504_v12 = vpack.c.bf16 %v155_v8, %v154_v7  ;;  %v158_v14 = vld [vmem:[#allocation4 + $0x20] sm:$0xff]  ;;  %v159_v15 = vld [vmem:[#allocation4 + $0x28] sm:$0xff] }
  0x39   :  { %499 = vmatpush3.bf16.msra.mxu0 %v498_v5  ;;  %v507_v13 = vpack.c.bf16 %v157_v10, %v156_v9  ;;  %v64_v16 = vld [vmem:[%s777_s0] sm:$0xff]  ;;  %v510_v17 = vpack.c.bf16 %v159_v15, %v158_v14  ;;  %v160_v18 = vld [vmem:[#allocation4 + $0x30] sm:$0xff]  ;;  %v161_v19 = vld [vmem:[#allocation4 + $0x38] sm:$0xff] }
  0x3a   :  { %500 = vmatprep.subr.bf16.mxu0 %v642_v0  ;;  %505 = vmatpush3.bf16.msra.mxu1 %v504_v12  ;;  %v513_v20 = vpack.c.bf16 %v161_v19, %v160_v18  ;;  %v162_v21 = vld [vmem:[#allocation4 + $0x40] sm:$0xff]  ;;  %v163_v22 = vld [vmem:[#allocation4 + $0x48] sm:$0xff]  ;;  %v164_v24 = vld [vmem:[#allocation4 + $0x50] sm:$0xff] }
  0x3b   :  { %506 = vmatprep.subr.bf16.mxu1 %v642_v0  ;;  %v516_v23 = vpack.c.bf16 %v163_v22, %v162_v21  ;;  %v165_v25 = vld [vmem:[#allocation4 + $0x58] sm:$0xff]  ;;  %v166_v27 = vld [vmem:[#allocation4 + $0x60] sm:$0xff]  ;;  %v167_v28 = vld [vmem:[#allocation4 + $0x68] sm:$0xff] }
  0x3c   :  { %v519_v26 = vpack.c.bf16 %v165_v25, %v164_v24  ;;  %v522_v29 = vpack.c.bf16 %v167_v28, %v166_v27  ;;  %v168_v30 = vld [vmem:[#allocation4 + $0x70] sm:$0xff]  ;;  %v169_v31 = vld [vmem:[#allocation4 + $0x78] sm:$0xff]  ;;  %v245_v33 = vld [vmem:[#allocation6] sm:$0xff] }
  0x3d   :  { %502 = vmatpush3.bf16.msra.mxu0 %v501_v11  ;;  %v525_v32 = vpack.c.bf16 %v169_v31, %v168_v30  ;;  %v246_v34 = vld [vmem:[#allocation6 + $0x8] sm:$0xff]  ;;  %v247_v35 = vld [vmem:[#allocation6 + $0x10] sm:$0xff]  ;;  %v248_v37 = vld [vmem:[#allocation6 + $0x18] sm:$0xff] }
  0x3e   :  { %527 = vmatprep.subr.bf16.mxu0 %v642_v0  ;;  %508 = vmatpush3.bf16.msra.mxu1 %v507_v13  ;;  %v528_v36 = vpack.c.bf16 %v246_v34, %v245_v33  ;;  %v531_v38 = vpack.c.bf16 %v248_v37, %v247_v35  ;;  %v249_v39 = vld [vmem:[#allocation6 + $0x20] sm:$0xff]  ;;  %v250_v40 = vld [vmem:[#allocation6 + $0x28] sm:$0xff]  ;;  %v251_v42 = vld [vmem:[#allocation6 + $0x30] sm:$0xff] }
  0x3f   :  { %509 = vmatprep.subr.bf16.mxu1 %v642_v0  ;;  %v534_v41 = vpack.c.bf16 %v250_v40, %v249_v39  ;;  %v252_v43 = vld [vmem:[#allocation6 + $0x38] sm:$0xff]  ;;  %v253_v45 = vld [vmem:[#allocation6 + $0x40] sm:$0xff]  ;;  %v254_v46 = vld [vmem:[#allocation6 + $0x48] sm:$0xff] }
  0x40   :  { %425 = vmatmul.mubr.msk.f32.vlgmr.msra.gmra.mrb[0].mxu0 %vm79_vm1, %v64_v16  ;;  %v537_v44 = vpack.c.bf16 %v252_v43, %v251_v42  ;;  %v540_v47 = vpack.c.bf16 %v254_v46, %v253_v45  ;;  %v371_v48 = vld [vmem:[%s782_s5] ss:$0 sm:$0xff]  ;;  %v255_v53 = vld [vmem:[#allocation6 + $0x50] sm:$0xff]  ;;  %v256_v54 = vld [vmem:[#allocation6 + $0x58] sm:$0xff] }
  0x41   :  { %494 = vmatprep.mubr.msk.f32.mxu0 %vm643_vm0, %v644_v1  ;;  %529 = vmatpush3.bf16.msra.mxu0 %v528_v36  ;;  %v543_v55 = vpack.c.bf16 %v256_v54, %v255_v53  ;;  %v257_v56 = vld [vmem:[#allocation6 + $0x60] sm:$0xff]  ;;  %v258_v57 = vld [vmem:[#allocation6 + $0x68] sm:$0xff]  ;;  %v259_v59 = vld [vmem:[#allocation6 + $0x70] sm:$0xff] }
  0x42   :  { %511 = vmatpush3.bf16.msra.mxu1 %v510_v17  ;;  %530 = vmatprep.subr.bf16.mxu0 %v642_v0  ;;  %v546_v58 = vpack.c.bf16 %v258_v57, %v257_v56  ;;  %v260_v60 = vld [vmem:[#allocation6 + $0x78] sm:$0xff]  ;;  %v373_v62 = vld [vmem:[%s782_s5 + $0x1] ss:$0 sm:$0xff]  ;;  %v375_v5 = vld [vmem:[%s782_s5 + $0x3] ss:$0 sm:$0xff] }
  0x43   :  { %512 = vmatprep.subr.bf16.mxu1 %v642_v0  ;;  %v549_v61 = vpack.c.bf16 %v260_v60, %v259_v59  ;;  %v65_v4 = vld [vmem:[%s778_s1] sm:$0xff] }
  0x44   :  { %v339_v6 = vmul.f32 %v375_v5, %v65_v4  ;;  %v342_v16 = vmul.f32 %v65_v4, %v65_v4  ;;  %v376_v18 = vld [vmem:[%s782_s5 + $0x4] ss:$0 sm:$0xff] }
  0x45   :  { %532 = vmatpush3.bf16.msra.mxu0 %v531_v38 }
  0x46   :  { %514 = vmatpush3.bf16.msra.mxu1 %v513_v20  ;;  %533 = vmatprep.subr.bf16.mxu0 %v642_v0  ;;  %v343_v17 = vmul.f32 -0.5, %v342_v16 }
  0x47   :  { %515 = vmatprep.subr.bf16.mxu1 %v642_v0 }
  0x48   :  { %v348_v19 = vsub.f32 %v343_v17, %v376_v18 }
  0x49   :  { %535 = vmatpush3.bf16.msra.mxu0 %v534_v41 }
  0x4a   :  { %517 = vmatpush3.bf16.msra.mxu1 %v516_v23  ;;  %536 = vmatprep.subr.bf16.mxu0 %v642_v0 }
  0x4b   :  { %518 = vmatprep.subr.bf16.mxu1 %v642_v0 }
  0x4d   :  { %538 = vmatpush3.bf16.msra.mxu0 %v537_v44 }
  0x4e   :  { %520 = vmatpush3.bf16.msra.mxu1 %v519_v26  ;;  %539 = vmatprep.subr.bf16.mxu0 %v642_v0 }
  0x4f   :  { %521 = vmatprep.subr.bf16.mxu1 %v642_v0 }
  0x51   :  { %541 = vmatpush3.bf16.msra.mxu0 %v540_v47 }
  0x52   :  { %523 = vmatpush3.bf16.msra.mxu1 %v522_v29  ;;  %542 = vmatprep.subr.bf16.mxu0 %v642_v0 }
  0x53   :  { %524 = vmatprep.subr.bf16.mxu1 %v642_v0 }
  0x55   :  { %544 = vmatpush3.bf16.msra.mxu0 %v543_v55 }
  0x56   :  { %526 = vmatpush3.bf16.msra.mxu1 %v525_v32  ;;  %545 = vmatprep.subr.bf16.mxu0 %v642_v0 }
  0x59   :  { %547 = vmatpush3.bf16.msra.mxu0 %v546_v58 }
  0x5a   :  { %548 = vmatprep.subr.bf16.mxu0 %v642_v0  ;;  %v374_v0 = vld [vmem:[%s782_s5 + $0x2] ss:$0 sm:$0xff] }
  0x5d   :  { %550 = vmatpush3.bf16.msra.mxu0 %v549_v61 }
 0x113   :  { %v149_v49 = vpop.f32.mrb[0].mxu0 }
 0x114   :  { %v150_v50 = vadd.f32 %v371_v48, %v149_v49  ;;  %v426_v51 = vpop.f32.mrb[1].mxu0 }
 0x116   :  { %559 = vtanh.f32 %v150_v50 }
 0x120   :  { %v560_v52 = vpop.eup %559 }
 0x121   :  { %460 = vmatmul.mubr.f32.vlgmr.msra.gmra.mrb[0].mxu1 %v560_v52 }
 0x1f4   :  { %v240_v63 = vpop.f32.mrb[0].mxu1 }
 0x1f5   :  { %v241_v1 = vadd.f32 %v373_v62, %v240_v63  ;;  %v461_v2 = vpop.f32.mrb[1].mxu1 }
 0x1f7   :  { %561 = vtanh.f32 %v241_v1 }
 0x201   :  { %v562_v3 = vpop.eup %561 }
 0x202   :  { %495 = vmatmul.mubr.f32.vlgmr.msra.gmra.mrb[2].mxu0 %v562_v3 }
 0x2d5   :  { %v331_v7 = vpop.f32.mrb[2].mxu0 }
 0x2d6   :  { %v332_v8 = vadd.f32 %v374_v0, %v331_v7  ;;  %v496_v9 = vpop.f32.mrb[3].mxu0 }
 0x2d8   :  { %v340_v10 = vadd.f32 %v339_v6, %v332_v8 }
 0x2da   :  { %563 = vtanh.f32 %v340_v10 }
 0x2e4   :  { %v564_v11 = vpop.eup %563 }
 0x2e5   :  { %v349_v12 = vmul.f32 %v564_v11, %v564_v11  ;;  %v359_v13 = vsel %vm355_vm2, %v564_v11, %v332_v8 }
 0x2e7   :  { %v350_v14 = vsub.f32 1.0, %v349_v12 }
 0x2e9   :  { %v351_v15 = vadd.f32 1e-06, %v350_v14 }
 0x2eb   :  { %565 = vlog2.f32 %v351_v15 }
 0x2f5   :  { %v566_v20 = vpop.eup %565 }
 0x2f6   :  { %v353_v21 = vmul.f32 0.6931472, %v566_v20 }
 0x2f8   :  { %v354_v22 = vsub.f32 %v348_v19, %v353_v21 }
 0x2fa   :  { %v356_v23 = vsel %vm355_vm2, %v354_v22, 0.0 }
 0x2fb   :  { %357 = vadd.xlane.f32.xlu0 %v356_v23 }
 0x388   :  { %v358_v24 = vpop.xlane.xlu0 %357 }
 0x389   :  { %v361_v25 = vsel %vm360_vm3, %v359_v13, %v358_v24 }
 0x38a   :  { %v363_v26 = vsel %vm362_vm4, %v361_v25, 0.0 }
 0x38b   :  { %364 = vst [vmem:[%s783_s6] sm:$0xff] %v363_v26 }
 0x38c   :  { %369 = vsyncpa [#allocation3], 1 }
 0x38d   :  { %370 = vsyncpa [#allocation5], 1 }

</bundles_post_ra>
